<compile_context>
chip_gen: v5e
topology: v5e:2x2
jax: 0.10.0
libtpu: 0.0.40
codegen_flags: <defaults>
</compile_context>

<pallas_src>
import functools
import math

import jax
import jax.numpy as jnp
import numpy as np
from jax.experimental import pallas as pl
from jax.experimental.pallas import tpu as pltpu

# Small, module-consistent shapes (dim must be divisible by num_heads=8).
NUM_TOKENS = 4                     # T
DIM = 32                           # D (512 in the real module; scaled down)
NUM_HEADS = 8                      # H
HEAD_DIM = DIM // NUM_HEADS
HT = NUM_HEADS * NUM_TOKENS        # per-(head, token) score columns
HT_PAD = ((HT + 127) // 128) * 128 # pad scores to full 128-lane tiles
SEQ = 8                            # aligned sequence length
SEQ_UNALIGNED = 7                  # exercises the S-padding + key-mask path
BATCH = 2                          # B


def prompt_learner_kernel(text_ref, w1_ref, pw_ref, bias_ref, out_ref, *, s_valid):
    """One batch block per grid step.

    text_ref : (B_blk, S_pad, D) bf16   key/value source (padded keys are zeros)
    w1_ref   : (D, D + HT_PAD)   bf16   [ Wv^T | Wk^T.Q_blk (scaled, padded) ]
    pw_ref   : (HT_PAD + D, D)   bf16   rows 0:HT_PAD = pooling matrix, rows HT_PAD: = Wo^T
    bias_ref : (2, D + HT_PAD)   f32    row0 = [ bv | bk.Q_blk ], row1 = [ bo + mean_t(prompt) | 0 ]
    out_ref  : (1, B_blk, D)     f32    mean over prompt tokens of (attn_out + prompt)
    """
    b_blk, s_len, d = text_ref.shape
    ht_pad = w1_ref.shape[1] - d

    # Layout-free merge of (batch, seq) rows: s_len is always a multiple of 8.
    x = text_ref[...].reshape(b_blk * s_len, d)                      # bf16

    biases = bias_ref[...]
    b1 = biases[0:1, :]                                              # (1, D + HT_PAD)
    out_bias = biases[1:2, :d]                                       # (1, D)  lane-aligned at D=512

    # One fused MXU matmul: columns 0:D are V (tile-aligned view), columns D: are
    # per-(head, token) attention scores (q-proj, k-proj, Q.K^T, scale folded in).
    h1 = jnp.dot(x, w1_ref[...], preferred_element_type=jnp.float32) + b1
    v = h1[:, :d]                                                    # (B*S, D) f32
    scores = h1[:, d:].reshape(b_blk, s_len, ht_pad)                 # (B_blk, S, HT_PAD) f32

    # Mask padded key positions (static: s_valid known at trace time).
    if s_valid < s_len:
        pos = jax.lax.broadcasted_iota(jnp.int32, (1, s_len, 1), 1)
        scores = jnp.where(pos < s_valid, scores, -1e30)

    # Softmax over the key axis, per (batch, head, token); all math in f32.
    m = jnp.max(scores, axis=1, keepdims=True)
    e = jnp.exp(scores - m)
    denom = jnp.sum(e, axis=1, keepdims=True)
    p = e * pl.reciprocal(denom, approx=True)                        # (B_blk, S, HT_PAD)

    pw = pw_ref[...]
    pool = pw[:ht_pad, :]                                            # (HT_PAD, D) bf16
    wo_t = pw[ht_pad:, :]                                            # (D, D)      bf16

    # Token-mean of probabilities + per-head broadcast over head_dim, as one
    # matmul with the constant pooling matrix (padded rows are zero).
    pbar = jnp.dot(p.reshape(b_blk * s_len, ht_pad).astype(jnp.bfloat16), pool,
                   preferred_element_type=jnp.float32)               # (B*S, D)

    # Token-averaged attention output (pre out-proj).
    o = (pbar * v).reshape(b_blk, s_len, d).sum(axis=1)              # (B_blk, D) f32

    # Output projection + residual (mean commuted through Wo; exact algebra).
    out = jnp.dot(o.astype(jnp.bfloat16), wo_t,
                  preferred_element_type=jnp.float32) + out_bias     # (B_blk, D)
    out_ref[...] = out.astype(out_ref.dtype)[None]


def _fuse_params(params):
    """Precompute fused kernel operands (f32 math, single bf16 cast at the end)."""
    prompt = params["prompt"]                                        # (T, D)
    t_tok, d = prompt.shape
    hd = HEAD_DIM
    ht, ht_pad = HT, HT_PAD
    scale = 1.0 / math.sqrt(hd)

    # Batch-invariant, pre-scaled queries (hoisted out of the kernel).
    q = (prompt @ params["wq_t"] + params["bq"]) * scale             # (T, D)

    # Block-diagonal query matrix: Q_blk[e, h*T + t] = q[t, e] iff e // hd == h.
    n = jnp.arange(ht)
    head_of_n = n // t_tok
    tok_of_n = n % t_tok
    head_of_d = jnp.arange(d) // hd
    q_cols = q.T[:, tok_of_n]                                        # (D, HT)
    q_blk = jnp.where(head_of_d[:, None] == head_of_n[None, :], q_cols, 0.0)

    # scores = text @ (Wk^T @ Q_blk) + bk @ Q_blk  (k-proj, q.k^T, scale fused).
    w_score = params["wk_t"] @ q_blk                                 # (D, HT)
    b_score = params["bk"] @ q_blk                                   # (1, HT)

    # Pad the score block to HT_PAD lanes: zero weight AND zero bias (padded
    # columns softmax to 1/S and are nulled by zero pooling rows).
    w_score = jnp.pad(w_score, ((0, 0), (0, ht_pad - ht)))
    b_score = jnp.pad(b_score, ((0, 0), (0, ht_pad - ht)))

    # Fused column order [ V | scores ] -> V slice is lane-tile aligned at D=512.
    w1 = jnp.concatenate([params["wv_t"], w_score], axis=1)          # (D, D + HT_PAD)
    b1 = jnp.concatenate([params["bv"], b_score], axis=1)            # (1, D + HT_PAD)

    # Pooling matrix: mean over tokens + broadcast each head over its head_dim.
    pool = (head_of_n[:, None] == head_of_d[None, :]).astype(jnp.float32) / t_tok
    pool = jnp.pad(pool, ((0, ht_pad - ht), (0, 0)))                 # (HT_PAD, D)
    pw = jnp.concatenate([pool, params["wo_t"]], axis=0)             # (HT_PAD + D, D)

    out_bias = params["bo"] + jnp.mean(prompt, axis=0, keepdims=True)  # (1, D)
    biases = jnp.concatenate(
        [b1,
         jnp.concatenate([out_bias, jnp.zeros((1, ht_pad), jnp.float32)], axis=1)],
        axis=0)                                                      # (2, D + HT_PAD)

    # Biases stay f32 (added after the f32-accumulated dots); matmul operands bf16.
    return w1.astype(jnp.bfloat16), pw.astype(jnp.bfloat16), biases


def _default_b_block(b, s_pad):
    """>=2 grid steps (v7x 2-TC sharding + DMA/compute pipelining) while keeping
    the fused matmul's M = b_block*s_pad near a full MXU M-tile (~256 rows).
    At DIM=512 re-derive against the per-generation VMEM budget (64 MiB on v7x)."""
    target_rows = 256
    b_blk = max(1, -(-target_rows // s_pad))          # ceil(target / S)
    if b >= 2:
        b_blk = min(b_blk, b // 2)                    # keep at least 2 grid steps
    while b % b_blk:
        b_blk -= 1
    return max(b_blk, 1)


def _invariant_spec(shape):
    """Grid-invariant operand: constant index_map, single-buffered (no point
    double-buffering a block that never changes; reclaims VMEM for text tiles)."""
    return pl.BlockSpec(shape, lambda b: (0,) * len(shape),
                        pipeline_mode=pl.Buffered(1))


def prompt_learner_forward(text_feat_sbd, params, b_block=None):
    """text_feat_sbd: (S, B, D) — PyTorch MHA layout. Returns (B, D) float32."""
    text_bsd = jnp.transpose(text_feat_sbd, (1, 0, 2))               # (B, S, D)
    B, S, D = text_bsd.shape

    # Pad S to a multiple of 8 so the in-kernel (B,S,D)->(B*S,D) merge is
    # layout-free; padded key rows are masked to -inf before the softmax.
    s_pad = ((S + 7) // 8) * 8
    if s_pad != S:
        text_bsd = jnp.pad(text_bsd, ((0, 0), (0, s_pad - S), (0, 0)))
    text_bsd = text_bsd.astype(jnp.bfloat16)                         # bf16 MXU operand, half DMA

    if b_block is None:
        b_block = _default_b_block(B, s_pad)
    assert B % b_block == 0
    nb = B // b_block

    w1, pw, biases = _fuse_params(params)
    n_fused = D + HT_PAD

    kernel = functools.partial(prompt_learner_kernel, s_valid=S)

    out = pl.pallas_call(
        kernel,
        out_shape=jax.ShapeDtypeStruct((nb, b_block, D), jnp.float32),
        grid_spec=pltpu.PrefetchScalarGridSpec(
            num_scalar_prefetch=0,
            grid=(nb,),
            in_specs=[
                pl.BlockSpec((b_block, s_pad, D), lambda b: (b, 0, 0)),  # text block (pipelined)
                _invariant_spec((D, n_fused)),                           # [V | score] weight
                _invariant_spec((HT_PAD + D, D)),                        # pooling | Wo^T
                _invariant_spec((2, n_fused)),                           # fused biases (f32)
            ],
            out_specs=pl.BlockSpec((1, b_block, D), lambda b: (b, 0, 0)),
        ),
        compiler_params=pltpu.CompilerParams(
            dimension_semantics=("parallel",),
        ),
    )(text_bsd, w1, pw, biases)

    return out.reshape(B, D)


def reference_forward(text_feat_sbd, params):
    """Pure-JAX f32 reference replicating torch.nn.MultiheadAttention math."""
    text = jnp.transpose(text_feat_sbd, (1, 0, 2))                    # (B, S, D)
    B, S, D = text.shape
    prompt = params["prompt"]                                         # (T, D)

    q = prompt @ params["wq_t"] + params["bq"]                        # (T, D)
    k = jnp.einsum("bsd,de->bse", text, params["wk_t"]) + params["bk"]
    v = jnp.einsum("bsd,de->bse", text, params["wv_t"]) + params["bv"]

    qh = q.reshape(NUM_TOKENS, NUM_HEADS, HEAD_DIM)
    kh = k.reshape(B, S, NUM_HEADS, HEAD_DIM)
    vh = v.reshape(B, S, NUM_HEADS, HEAD_DIM)

    s = jnp.einsum("thd,bshd->bhts", qh, kh) / math.sqrt(HEAD_DIM)
    a = jax.nn.softmax(s, axis=-1)
    o = jnp.einsum("bhts,bshd->bthd", a, vh).reshape(B, NUM_TOKENS, D)

    attn = jnp.einsum("btd,de->bte", o, params["wo_t"]) + params["bo"] + prompt[None]
    return attn.mean(axis=1)                                          # (B, D)


def init_params(key):
    """Deterministic synthetic parameters matching nn.MultiheadAttention shapes."""
    k_prompt, k_inw, k_inb, k_outw, k_outb = jax.random.split(key, 5)
    prompt = jax.random.normal(k_prompt, (NUM_TOKENS, DIM), jnp.float32)
    in_proj_w = jax.random.normal(k_inw, (3 * DIM, DIM), jnp.float32) * 0.1
    in_proj_b = jax.random.normal(k_inb, (3 * DIM,), jnp.float32) * 0.1
    out_proj_w = jax.random.normal(k_outw, (DIM, DIM), jnp.float32) * 0.1
    out_proj_b = jax.random.normal(k_outb, (DIM,), jnp.float32) * 0.1
    return {
        "prompt": prompt,
        # PyTorch computes x @ W^T; pre-transpose so downstream math does x @ W.
        "wq_t": in_proj_w[0 * DIM:1 * DIM].T,
        "wk_t": in_proj_w[1 * DIM:2 * DIM].T,
        "wv_t": in_proj_w[2 * DIM:3 * DIM].T,
        "wo_t": out_proj_w.T,
        "bq": in_proj_b[0 * DIM:1 * DIM].reshape(1, DIM),
        "bk": in_proj_b[1 * DIM:2 * DIM].reshape(1, DIM),
        "bv": in_proj_b[2 * DIM:3 * DIM].reshape(1, DIM),
        "bo": out_proj_b.reshape(1, DIM),
    }


if __name__ == "__main__":
    key = jax.random.PRNGKey(0)
    k_params, k_text1, k_text2 = jax.random.split(key, 3)
    params = init_params(k_params)

    # Case 1: aligned sequence length. Case 2: unaligned S -> pad + key mask path.
    for s_len, k_text in ((SEQ, k_text1), (SEQ_UNALIGNED, k_text2)):
        text_feat = jax.random.normal(k_text, (s_len, BATCH, DIM), jnp.float32)

        out = jax.block_until_ready(prompt_learner_forward(text_feat, params))
        ref = reference_forward(text_feat, params)

        assert out.shape == (BATCH, DIM)
        # Tolerance reflects bf16 MXU operands (f32 accumulation) and the
        # approx-reciprocal softmax; the fusion algebra itself is exact.
        np.testing.assert_allclose(np.asarray(out), np.asarray(ref),
                                   rtol=2e-2, atol=2e-2)

    print("KERNEL_OK")
</pallas_src>

<mosaic_0001>
module attributes {stable_mosaic.version = 11 : i64} {
  func.func @prompt_learner_kernel(%arg0: i32, %arg1: memref<1x8x32xbf16, #tpu.memory_space<vmem>>, %arg2: memref<32x160xbf16, #tpu.memory_space<vmem>>, %arg3: memref<160x32xbf16, #tpu.memory_space<vmem>>, %arg4: memref<2x160xf32, #tpu.memory_space<vmem>>, %arg5: memref<1x1x32xf32, #tpu.memory_space<vmem>>) attributes {dimension_semantics = [#tpu.dimension_semantics<parallel>], iteration_bounds = array<i64: 2>, scalar_prefetch = 0 : i64, scratch_operands = 0 : i64, tpu.core_type = #tpu.core_type<tc>, window_params = [{transform_indices = @transform_0, window_bounds = array<i64: 1, 8, 32>}, {pipeline_mode = #tpu.pipeline_mode<synchronous>, transform_indices = @transform_1, window_bounds = array<i64: 32, 160>}, {pipeline_mode = #tpu.pipeline_mode<synchronous>, transform_indices = @transform_2, window_bounds = array<i64: 160, 32>}, {pipeline_mode = #tpu.pipeline_mode<synchronous>, transform_indices = @transform_3, window_bounds = array<i64: 2, 160>}, {transform_indices = @transform_4, window_bounds = array<i64: 1, 1, 32>}]} {
    %c0 = arith.constant 0 : index
    %c0_0 = arith.constant 0 : index
    %c0_1 = arith.constant 0 : index
    %0 = vector.load %arg1[%c0, %c0_0, %c0_1] : memref<1x8x32xbf16, #tpu.memory_space<vmem>>, vector<1x8x32xbf16>
    %1 = vector.shape_cast %0 : vector<1x8x32xbf16> to vector<8x32xbf16>
    %c0_2 = arith.constant 0 : index
    %c0_3 = arith.constant 0 : index
    %2 = vector.load %arg4[%c0_2, %c0_3] : memref<2x160xf32, #tpu.memory_space<vmem>>, vector<2x160xf32>
    %3 = vector.extract_strided_slice %2 {offsets = [0, 0], sizes = [1, 160], strides = [1, 1]} : vector<2x160xf32> to vector<1x160xf32>
    %4 = vector.extract_strided_slice %2 {offsets = [1, 0], sizes = [1, 32], strides = [1, 1]} : vector<2x160xf32> to vector<1x32xf32>
    %c0_4 = arith.constant 0 : index
    %c0_5 = arith.constant 0 : index
    %5 = vector.load %arg2[%c0_4, %c0_5] : memref<32x160xbf16, #tpu.memory_space<vmem>>, vector<32x160xbf16>
    %cst = arith.constant dense<0.000000e+00> : vector<8x160xf32>
    %6 = tpu.matmul %1, %5, %cst {dimension_numbers = #tpu.dot_dimension_numbers<[1], [0], [0], [1], [0, 0, 1, 1], [], []>} : vector<8x32xbf16>, vector<32x160xbf16>, vector<8x160xf32> -> vector<8x160xf32>
    %7 = vector.broadcast %3 : vector<1x160xf32> to vector<8x160xf32>
    %8 = arith.addf %6, %7 : vector<8x160xf32>
    %9 = vector.extract_strided_slice %8 {offsets = [0, 0], sizes = [8, 32], strides = [1, 1]} : vector<8x160xf32> to vector<8x32xf32>
    %10 = vector.extract_strided_slice %8 {offsets = [0, 32], sizes = [8, 128], strides = [1, 1]} : vector<8x160xf32> to vector<8x128xf32>
    %11 = vector.shape_cast %10 : vector<8x128xf32> to vector<1x8x128xf32>
    %cst_6 = arith.constant dense<0xFF800000> : vector<1x128xf32>
    %12 = vector.multi_reduction <maximumf>, %11, %cst_6 [1] : vector<1x8x128xf32> to vector<1x128xf32>
    %13 = vector.shape_cast %12 : vector<1x128xf32> to vector<1x1x128xf32>
    %14 = vector.broadcast %13 : vector<1x1x128xf32> to vector<1x8x128xf32>
    %15 = arith.subf %11, %14 : vector<1x8x128xf32>
    %16 = math.exp %15 : vector<1x8x128xf32>
    %cst_7 = arith.constant dense<0.000000e+00> : vector<1x128xf32>
    %17 = vector.multi_reduction <add>, %16, %cst_7 [1] : vector<1x8x128xf32> to vector<1x128xf32>
    %18 = vector.shape_cast %17 : vector<1x128xf32> to vector<1x1x128xf32>
    %19 = tpu.reciprocal %18 {approx = true} : vector<1x1x128xf32> -> vector<1x1x128xf32>
    %20 = vector.broadcast %19 : vector<1x1x128xf32> to vector<1x8x128xf32>
    %21 = arith.mulf %16, %20 : vector<1x8x128xf32>
    %c0_8 = arith.constant 0 : index
    %c0_9 = arith.constant 0 : index
    %22 = vector.load %arg3[%c0_8, %c0_9] : memref<160x32xbf16, #tpu.memory_space<vmem>>, vector<160x32xbf16>
    %23 = vector.extract_strided_slice %22 {offsets = [0, 0], sizes = [128, 32], strides = [1, 1]} : vector<160x32xbf16> to vector<128x32xbf16>
    %24 = vector.extract_strided_slice %22 {offsets = [128, 0], sizes = [32, 32], strides = [1, 1]} : vector<160x32xbf16> to vector<32x32xbf16>
    %25 = vector.shape_cast %21 : vector<1x8x128xf32> to vector<8x128xf32>
    %26 = arith.truncf %25 : vector<8x128xf32> to vector<8x128xbf16>
    %cst_10 = arith.constant dense<0.000000e+00> : vector<8x32xf32>
    %27 = tpu.matmul %26, %23, %cst_10 {dimension_numbers = #tpu.dot_dimension_numbers<[1], [0], [0], [1], [0, 0, 1, 1], [], []>} : vector<8x128xbf16>, vector<128x32xbf16>, vector<8x32xf32> -> vector<8x32xf32>
    %28 = arith.mulf %27, %9 : vector<8x32xf32>
    %29 = vector.shape_cast %28 : vector<8x32xf32> to vector<1x8x32xf32>
    %cst_11 = arith.constant dense<0.000000e+00> : vector<1x32xf32>
    %30 = vector.multi_reduction <add>, %29, %cst_11 [1] : vector<1x8x32xf32> to vector<1x32xf32>
    %31 = arith.truncf %30 : vector<1x32xf32> to vector<1x32xbf16>
    %cst_12 = arith.constant dense<0.000000e+00> : vector<1x32xf32>
    %32 = tpu.matmul %31, %24, %cst_12 {dimension_numbers = #tpu.dot_dimension_numbers<[1], [0], [0], [1], [0, 0, 1, 1], [], []>} : vector<1x32xbf16>, vector<32x32xbf16>, vector<1x32xf32> -> vector<1x32xf32>
    %33 = arith.addf %32, %4 : vector<1x32xf32>
    %34 = vector.shape_cast %33 : vector<1x32xf32> to vector<1x1x32xf32>
    %c0_13 = arith.constant 0 : index
    %c0_14 = arith.constant 0 : index
    %c0_15 = arith.constant 0 : index
    %35 = vector.load %arg5[%c0_13, %c0_14, %c0_15] : memref<1x1x32xf32, #tpu.memory_space<vmem>>, vector<1x1x32xf32>
    tpu.vector_store %arg5[%c0_13, %c0_14, %c0_15], %34 {strides = array<i32>} : memref<1x1x32xf32, #tpu.memory_space<vmem>>, vector<1x1x32xf32>,
    return
  }
  func.func @transform_0(%arg0: i32) -> (i32, i32, i32) {
    %c0_i32 = arith.constant 0 : i32
    %c0_i32_0 = arith.constant 0 : i32
    %c0_i32_1 = arith.constant 0 : i32
    return %arg0, %c0_i32, %c0_i32_0 : i32, i32, i32
  }
  func.func @transform_1(%arg0: i32) -> (i32, i32) {
    %c0_i32 = arith.constant 0 : i32
    %c0_i32_0 = arith.constant 0 : i32
    %c0_i32_1 = arith.constant 0 : i32
    return %c0_i32, %c0_i32_0 : i32, i32
  }
  func.func @transform_2(%arg0: i32) -> (i32, i32) {
    %c0_i32 = arith.constant 0 : i32
    %c0_i32_0 = arith.constant 0 : i32
    %c0_i32_1 = arith.constant 0 : i32
    return %c0_i32, %c0_i32_0 : i32, i32
  }
  func.func @transform_3(%arg0: i32) -> (i32, i32) {
    %c0_i32 = arith.constant 0 : i32
    %c0_i32_0 = arith.constant 0 : i32
    %c0_i32_1 = arith.constant 0 : i32
    return %c0_i32, %c0_i32_0 : i32, i32
  }
  func.func @transform_4(%arg0: i32) -> (i32, i32, i32) {
    %c0_i32 = arith.constant 0 : i32
    %c0_i32_0 = arith.constant 0 : i32
    %c0_i32_1 = arith.constant 0 : i32
    return %arg0, %c0_i32, %c0_i32_0 : i32, i32, i32
  }
}

</mosaic_0001>

<bundles_post_ra>
// kernel: tpu_custom_call.1
= control target key start
LH: loop header
LB: loop body
LE: loop exit
PB: predicated region body
PF: predicated region fallthrough
CT: control target
= control target key end

     0   :  { %9 = vsyncpa [#allocation3], 0  ;;  %s874_s0 = inlined_call_operand.vmem [shape: bf16[2,8,32], index: 0, kind: input, shape index: {}]   ;;  %s875_s1 = inlined_call_operand.vmem [shape: bf16[32,160], index: 1, kind: input, shape index: {}]   ;;  %s876_s2 = inlined_call_operand.vmem [shape: bf16[160,32], index: 2, kind: input, shape index: {}]   ;;  %s877_s3 = inlined_call_operand.vmem [shape: f32[2,160], index: 3, kind: input, shape index: {}]   ;;  %s878_s4 = inlined_call_operand.hbm [shape: f32[2,1,32], index: 4, kind: output, shape index: {}]  }
   0x1   :  { %11 = vsyncpa [#allocation3 + $0x1], 0  ;;  %s714_s15 = smov 0   ;;  %s716_s16 = smov 0  }
   0x2   :  { %s718_s17 = smov 0   ;;  %s720_s18 = smov 0  }
   0x3 LB: > { %s735_s19 = sadd.s32 4294967295, %s686_s18   ;;  %s496_s20 = sadd.s32 4294967294, %s686_s18   ;;  %s686_s18 = sphi %s720_s18, %s884_s18   ;;  %s682_s17 = sphi %s718_s17, %s883_s17   ;;  %s678_s16 = sphi %s716_s16, %s882_s16   ;;  %s674_s15 = sphi %s714_s15, %s881_s15  }
   0x4   : > { %s739_s21 = sadd.s32 1, %s686_s18   ;;  %s113_s22 = sadd.s32 1, %s682_s17 }
   0x5   : > { %s110_s23 = ssub.s32 %s686_s18, %s739_s21  ;;  %p123_p0 = scmp.ne.s32.totalorder %s682_s17, %s678_s16 }
   0x6   : > { %p111_p1 = scmp.eq.s32.totalorder %s110_s23, 0  ;;  %p124_p2 = scmp.eq.s32.totalorder %s735_s19, 1 }
   0x7   : > { %p129_p3 = scmp.ne.s32.totalorder %s678_s16, %s674_s15  ;;  %p130_p4 = scmp.eq.s32.totalorder %s496_s20, 1 }
   0x8   : > { %s750_s24 = scalar_select %p111_p1, %s682_s17, %s113_s22  }
   0x9   : > { %p752_p5 = por %p124_p2, %p123_p0  ;;  %p756_p6 = por %p130_p4, %p129_p3 }
   0xa   : > { %p499_p7 = scmp.ge.s32.totalorder %s686_s18, 1  ;;  %p164_p8 = scmp.lt.s32.totalorder %s686_s18, 3 }
   0xc   : > { %p165_p9 = pnand %p499_p7, %p164_p8 }
   0xd   : > { %p188_p10 = scmp.lt.s32.totalorder (!%p165_p9), %s735_s19, 1  ;;  %s688_s28 = smov (!%p165_p9), 96  }
   0xe   : > { %168 = sbr.rel (%p165_p9) target bundleno = 618 (0x26a), region = 36  ;;  %s186_s11 = sand.u32 (!%p165_p9), 1, %s678_s16  }
   0xf   : > { %s437_s14 = scalar_lea.hbm (!%p165_p9), %s878_s4, %s735_s19  ;;  %s187_s20 = scalar_lea.vmem (!%p165_p9), [#allocation2], %s186_s11 }
  0x10   : > { %s439_s22 = sshll.u32 (!%p165_p9), %s187_s20, 4  ;;  %s644_s5 = scalar_lea.hbm (!%p165_p9), %s878_s4, 2  ;;  %s440_s22 = int_to_ptr.vmem [resolvable:$true] %s439_s22 }
  0x13   : > { %v511_v0 = vld [vmem:[%s875_s1 + $0x10] sm:$0xf]  ;;  %v565_v1 = vld [vmem:[%s875_s1 + $0x14] sm:$0xf0]  ;;  %v564_v2 = vld [vmem:[%s875_s1 + $0x14] sm:$0xf] }
  0x14   : > { %v512_v3 = vor.u32 %v565_v1, %v511_v0  ;;  %v513_v4 = vld [vmem:[%s875_s1 + $0x18] sm:$0xf0]  ;;  %v503_v5 = vld [vmem:[%s875_s1] sm:$0xf]  ;;  %v563_v6 = vld [vmem:[%s875_s1 + $0x4] sm:$0xf0] }
  0x15   : > { %v516_v7 = vor.u32 %v564_v2, %v513_v4  ;;  %v562_v8 = vld [vmem:[%s875_s1 + $0x4] sm:$0xf]  ;;  %v505_v9 = vld [vmem:[%s875_s1 + $0x8] sm:$0xf0]  ;;  %v504_v10 = vor.u32 %v563_v6, %v503_v5  ;;  %s189_s23 = scalar_select %p188_p10, %s735_s19, 1  ;;  %vm226_vm0 = vcmask 261120  }
  0x16   : > { %236 = vmatpush.bf16.msra.mxu0 %v512_v3  ;;  %v508_v11 = vor.u32 %v562_v8, %v505_v9  ;;  %v796_v13 = vld [vmem:[%s877_s3] sm:$0xf]  ;;  %vm256_vm1 = vcmask 1047808   ;;  %v573_v45 = vld [vmem:[%s876_s2 + $0x38] sm:$0xff]  ;;  %v572_v49 = vld [vmem:[%s876_s2 + $0x30] sm:$0xff]  ;;  %vm323_vm2 = vcmask 785408  }
  0x17   : > { %249 = vmatpush.bf16.msra.mxu1 %v516_v7  ;;  %s500_s27 = sshll.u32 %s189_s23, 2  ;;  %v200_v14 = vperm.slane %v796_v13, 0  ;;  %v201_v15 = vperm.slane %v796_v13, 2  ;;  %374 = vmatpush.bf16.msra.mxu2 %v573_v45  ;;  %v571_v54 = vld [vmem:[%s876_s2 + $0x28] sm:$0xff]  ;;  %v570_v59 = vld [vmem:[%s876_s2 + $0x20] sm:$0xff]  ;;  %v569_v62 = vld [vmem:[%s876_s2 + $0x18] sm:$0xff] }
  0x18   : > { %s191_s30 = scalar_lea.vmem %s874_s0, %s500_s27  ;;  %v568_v63 = vld [vmem:[%s876_s2 + $0x10] sm:$0xff]  ;;  %v567_v6 = vld [vmem:[%s876_s2 + $0x8] sm:$0xff]  ;;  %v566_v7 = vld [vmem:[%s876_s2] sm:$0xff]  ;;  %s441_s23 = sshll.u32 %s437_s14, 4  ;;  %vm426_vm3 = vcmask 253952   ;;  %s442_s23 = int_to_ptr.hbm [resolvable:$true] %s441_s23 }
  0x19   : > { %v193_v12 = vld [vmem:[%s191_s30] sm:$0xf]  ;;  %v204_v16 = vperm.slane %v200_v14, 0  ;;  %v205_v17 = vperm.slane %v201_v15, 0  ;;  %s429_s27 = scalar_lea.sflag [#allocation3], %s186_s11 }
  0x1a   : > { %237 = vmatpush.bf16.msra.mxu0 %v504_v10 }
  0x1b   : > { %250 = vmatpush.bf16.msra.mxu1 %v508_v11  ;;  %375 = vmatpush.bf16.msra.mxu2 %v572_v49  ;;  %v575_v11 = vld [vmem:[%s876_s2 + $0x48] sm:$0xff] }
  0x1c   : > { %419 = vmatpush.bf16.msra.mxu3 %v575_v11 }
  0x1d   : > { %517 = vmatmul.msk.bf16.vlgmr.msra.gmra.mxu0 %vm226_vm0, %v193_v12 }
  0x1e   : > { %518 = vmatmul.msk.bf16.vlgmr.msra.gmra.mxu1 %vm226_vm0, %v193_v12  ;;  %v574_v12 = vld [vmem:[%s876_s2 + $0x40] sm:$0xff] }
  0x1f   : > { %376 = vmatpush.bf16.msra.mxu2 %v571_v54 }
  0x20   : > { %420 = vmatpush.bf16.msra.mxu3 %v574_v12 }
  0x23   : > { %377 = vmatpush.bf16.msra.mxu2 %v570_v59 }
  0x27   : > { %378 = vmatpush.bf16.msra.mxu2 %v569_v62 }
  0x2b   : > { %379 = vmatpush.bf16.msra.mxu2 %v568_v63 }
  0x2f   : > { %380 = vmatpush.bf16.msra.mxu2 %v567_v6 }
  0x33   : > { %381 = vmatpush.bf16.msra.mxu2 %v566_v7 }
  0x9a   : > { %v239_v18 = vpop.f32.mrf.mxu0 }
  0x9b   : > { %v800_v19 = vadd.f32 %v239_v18, %v204_v16  ;;  %v252_v20 = vpop.f32.mrf.mxu1 }
  0x9c   : > { %v253_v21 = vadd.f32 %v252_v20, %v205_v17 }
  0x9d   : > { %v257_v22 = vsel %vm256_vm1, %v800_v19, -inf }
  0x9e   : > { %v258_v23 = vrot.slane %v257_v22, 4  ;;  %v264_v24 = vsel %vm226_vm0, %v253_v21, -inf }
  0x9f   : > { %v265_v25 = vrot.slane %v264_v24, 4 }
  0xa0   : > { %v259_v26 = vmax.f32 %v257_v22, %v258_v23 }
  0xa1   : > { %v266_v27 = vmax.f32 %v264_v24, %v265_v25 }
  0xa2   : > { %v260_v28 = vrot.slane %v259_v26, 2  ;;  %v241_v29 = vpop.f32.mrf.mxu0 }
  0xa3   : > { %v267_v30 = vrot.slane %v266_v27, 2  ;;  %v254_v31 = vpop.f32.mrf.mxu1 }
  0xa4   : > { %v261_v32 = vmax.f32 %v259_v26, %v260_v28 }
  0xa5   : > { %v268_v33 = vmax.f32 %v266_v27, %v267_v30 }
  0xa6   : > { %v262_v34 = vrot.slane %v261_v32, 1 }
  0xa7   : > { %v269_v35 = vrot.slane %v268_v33, 1 }
  0xa8   : > { %v263_v36 = vmax.f32 %v261_v32, %v262_v34 }
  0xa9   : > { %v270_v37 = vmax.f32 %v268_v33, %v269_v35 }
  0xaa   : > { %v271_v38 = vsub.f32 %v800_v19, %v263_v36 }
  0xab   : > { %v272_v39 = vsub.f32 %v253_v21, %v270_v37 }
  0xac   : > { %v273_v40 = vmul.f32 1.442695, %v271_v38 }
  0xad   : > { %v275_v41 = vmul.f32 1.442695, %v272_v39 }
  0xae   : > { %616 = vpow2.f32 %v273_v40 }
  0xaf   : > { %618 = vpow2.f32 %v275_v41 }
  0xb4   : > { %v617_v42 = vpop.eup %616 }
  0xb5   : > { %v619_v43 = vpop.eup %618  ;;  %v277_v44 = vsel %vm256_vm1, %v617_v42, 0.0 }
  0xb6   : > { %v278_v46 = vrot.slane %v277_v44, 4  ;;  %v284_v47 = vsel %vm226_vm0, %v619_v43, 0.0 }
  0xb7   : > { %v285_v48 = vrot.slane %v284_v47, 4 }
  0xb8   : > { %v279_v50 = vadd.f32 %v278_v46, %v277_v44 }
  0xb9   : > { %v286_v51 = vadd.f32 %v285_v48, %v284_v47 }
  0xba   : > { %v280_v52 = vrot.slane %v279_v50, 2 }
  0xbb   : > { %v287_v53 = vrot.slane %v286_v51, 2 }
  0xbc   : > { %v281_v55 = vadd.f32 %v280_v52, %v279_v50 }
  0xbd   : > { %v288_v56 = vadd.f32 %v287_v53, %v286_v51 }
  0xbe   : > { %v282_v57 = vrot.slane %v281_v55, 1 }
  0xbf   : > { %v289_v58 = vrot.slane %v288_v56, 1 }
  0xc0   : > { %v283_v60 = vadd.f32 %v282_v57, %v281_v55 }
  0xc1   : > { %v290_v61 = vadd.f32 %v289_v58, %v288_v56 }
  0xc2   : > { %620 = vrcp.f32 %v283_v60 }
  0xc3   : > { %622 = vrcp.f32 %v290_v61 }
  0xc8   : > { %v621_v0 = vpop.eup %620 }
  0xc9   : > { %v293_v1 = vmul.f32 %v621_v0, %v617_v42  ;;  %v623_v3 = vpop.eup %622 }
  0xca   : > { %v294_v4 = vmul.f32 %v623_v3, %v619_v43 }
  0xcb   : > { %v315_v2 = vpack.c.bf16 %v293_v1, %v293_v1 }
  0xcc   : > { %v316_v5 = vpack.c.bf16 %v294_v4, %v294_v4 }
  0xcd   : > { %319 = vrot.lane.b32.xlu0 %v315_v2, %s688_s28 }
  0xd5   : > { %321 = vrot.lane.b32.xlu0 %v316_v5, %s688_s28  ;;  %s638_s28 = sshra.s32 %s442_s23, 4  ;;  %s639_s28 = int_to_ptr.hbm [resolvable:$true] %s638_s28 }
  0xd6   : > { %s640_s29 = scalar_lea.hbm %s639_s28, 1  ;;  %p645_p0 = scmp.lt.s32.totalorder %s639_s28, %s878_s4 }
  0xd7   : > { %p641_p11 = scmp.ne.s32.totalorder %s639_s28, %s640_s29  ;;  %p646_p1 = scmp.lt.s32.totalorder %s644_s5, %s640_s29 }
  0xd9   : > { %p642_p12 = pnand %p641_p11, %p752_p5  ;;  %p647_p2 = por %p646_p1, %p645_p0 }
  0xdb   : > { %p643_p13 = pneg %p642_p12 }
  0xdd   : > { %p648_p3 = pnand %p647_p2, %p643_p13 }
 0x13f   : > { %v320_v8 = vpop.permute.xlu0 %319 }
 0x147   : > { %v322_v9 = vpop.permute.xlu0 %321 }
 0x148   : > { %v324_v10 = vsel %vm323_vm2, %v320_v8, %v322_v9 }
 0x149   : > { %382 = vmatmul.bf16.vlgmr.msra.gmra.mxu2 %v324_v10 }
 0x1cc   : > { %v383_v14 = vpop.f32.mrf.mxu2 }
 0x1cd   : > { %v387_v15 = vmul.f32 %v383_v14, %v800_v19  ;;  %v408_v19 = vperm.slane %v796_v13, 1 }
 0x1cf   : > { %v388_v16 = vsel %vm226_vm0, %v387_v15, 0.0 }
 0x1d0   : > { %v389_v17 = vrot.slane %v388_v16, 4 }
 0x1d2   : > { %v390_v18 = vadd.f32 %v389_v17, %v388_v16 }
 0x1d4   : > { %v391_v20 = vrot.slane %v390_v18, 2  ;;  %v385_v21 = vpop.f32.mrf.mxu2 }
 0x1d6   : > { %v392_v22 = vadd.f32 %v391_v20, %v390_v18 }
 0x1d8   : > { %v393_v23 = vrot.slane %v392_v22, 1 }
 0x1da   : > { %v394_v24 = vadd.f32 %v393_v23, %v392_v22 }
 0x1dc   : > { %v395_v25 = vpack.c.bf16 %v394_v24, %v394_v24 }
 0x1de   : > { %559 = vmatmul.msk.bf16.vlgmr.msra.gmra.mxu3 %vm226_vm0, %v395_v25 }
 0x261   : > { %v422_v26 = vpop.f32.mrf.mxu3 }
 0x262   : > { %v423_v27 = vadd.f32 %v422_v26, %v408_v19 }
 0x264   : > { %427 = vst.msk [vmem:[%s187_s20] sm:$0x1] %vm426_vm3, %v423_v27 }
 0x265   : > { %651 = shalt.err (!%p648_p3)
}
 0x266   : > { %576 = dma.vmem_to_hbm [thread:$0]  (%p752_p5), %s440_s22, 16, %s442_s23, %s429_s27  }
 0x269   : > { %v424_v13 = vpop.f32.mrf.mxu3 }
 0x26a PF: > { %p582_p4 = scmp.ge.s32.totalorder %s686_s18, 2  ;;  %s453_s8 = sand.u32 1, %s674_s15  }
 0x26b   : > { %s454_s9 = scalar_lea.sflag [#allocation3], %s453_s8 }
 0x26c   : > { %p579_p7 = pnand %p582_p4, %p756_p6 }
 0x26e   : > { %p580_p8 = pneg %p579_p7 }
 0x270   : > { %669 = dma.done.wait (%p580_p8), %s454_s9, 16  }
 0x271   : > { %671 = vsyncadd (%p580_p8), %s454_s9, 4294967280  ;;  %p14_p9 = scmp.ge.s32.totalorder %s739_s21, 4   ;;  %s881_s15 = smov %s678_s16 }
 0x272   : > { %s882_s16 = smov %s682_s17  ;;  %s883_s17 = smov %s750_s24 }
 0x273   : > { %s884_s18 = smov %s739_s21  ;;  %16 = sbr.rel (!%p14_p9) target bundleno = 3 (0x3), region = 71 }
 0x278   :  { %459 = vsyncpa [#allocation3], 1 }
 0x279   :  { %461 = vsyncpa [#allocation3 + $0x1], 1 }

</bundles_post_ra>
